<compile_context>
chip_gen: v7x
topology: tpu7x:2x2x1
jax: 0.10.0
libtpu: 0.0.40
codegen_flags: <defaults>
</compile_context>

<pallas_src>
import jax
import jax.numpy as jnp
from jax.experimental import pallas as pl
from jax.experimental.pallas import tpu as pltpu

_MIN_BLOCK_ROWS = 32           # multiple of 8 sublanes; covers f32/bf16/int8 packing
_MIN_GRID_STEPS = 4            # keep both v7x TCs busy + overlap DMA with compute
_TARGET_BLOCK_BYTES = 4 << 20  # ~4 MiB per buffer, dtype-aware
_VMEM_LIMIT_BYTES = 32 << 20   # 2 in + 2 out x 4 MiB = 16 MiB << limit on all gens


def _swish_kernel(x_ref, o_ref):
    # f32 math regardless of storage dtype; HBM traffic stays in the input dtype.
    x = x_ref[...].astype(jnp.float32)
    # EUP-friendly sigmoid: exp and reciprocal both go to the EUP slot; the
    # kernel is HBM-bound so exact reciprocal costs nothing.
    sig = pl.reciprocal(1.0 + jnp.exp(-x), approx=False)
    o_ref[...] = (x * sig).astype(o_ref.dtype)


def _swish_2d(x2d, *, allow_input_fusion=False, donate=False):
    """Run the Swish kernel on a (rows, lanes) view; lanes is a multiple of 128."""
    rows, lanes = x2d.shape
    dtype = x2d.dtype
    itemsize = jnp.dtype(dtype).itemsize

    # Byte-based block sizing (dtype-aware), rounded down to 32 sublanes.
    block_rows = max(
        _MIN_BLOCK_ROWS,
        (_TARGET_BLOCK_BYTES // (lanes * itemsize)) // _MIN_BLOCK_ROWS * _MIN_BLOCK_ROWS,
    )
    if rows > 2 * _MIN_BLOCK_ROWS:
        # Force >= _MIN_GRID_STEPS grid steps even if blocks shrink below the
        # byte target: guarantees both v7x TCs get work and DMA pipelining on
        # single-core chips; last (partial) block is edge-masked by Pallas.
        per_step = pl.cdiv(pl.cdiv(rows, _MIN_GRID_STEPS), _MIN_BLOCK_ROWS) * _MIN_BLOCK_ROWS
        block_rows = min(block_rows, per_step)
    else:
        block_rows = min(block_rows, rows)  # full-extent block (always legal)
    grid = (pl.cdiv(rows, block_rows),)

    n = rows * lanes
    cost = pl.CostEstimate(
        flops=4 * n,                      # neg, add, recip, mul (approx)
        transcendentals=n,                # one exp per element
        bytes_accessed=2 * n * itemsize,  # read x + write out
    )

    return pl.pallas_call(
        _swish_kernel,
        out_shape=jax.ShapeDtypeStruct((rows, lanes), dtype),
        grid_spec=pltpu.PrefetchScalarGridSpec(
            num_scalar_prefetch=0,
            grid=grid,
            in_specs=[pl.BlockSpec((block_rows, lanes), lambda i: (i, 0))],
            out_specs=pl.BlockSpec((block_rows, lanes), lambda i: (i, 0)),
        ),
        compiler_params=pltpu.CompilerParams(
            dimension_semantics=("parallel",),       # shards grid across v7x's 2 TCs
            vmem_limit_bytes=_VMEM_LIMIT_BYTES,
            allow_input_fusion=([True] if allow_input_fusion else None),
        ),
        cost_estimate=cost,
        input_output_aliases=({0: 0} if donate else {}),
    )(x2d)


def swish(x, *, donate=False):
    """Elementwise Swish matching the PyTorch module's forward:
    returns x * sigmoid(x) with unchanged shape/dtype."""
    orig_shape = x.shape
    dtype = x.dtype
    n = x.size
    if n == 0:
        return x

    x_flat = jnp.ravel(x)

    def _jnp_swish(v):  # plain-jnp path for tiny tensors / the <128-element tail
        vf = v.astype(jnp.float32)
        return (vf * jax.nn.sigmoid(vf)).astype(dtype)

    n_main = (n // 128) * 128
    if n_main == 0:
        # Sub-vreg tensor: a Pallas launch is pure overhead; one fused XLA op.
        return _jnp_swish(x_flat).reshape(orig_shape)

    # Widest lane-dense last dim dividing the aligned prefix.
    lanes = 128
    for cand in (1024, 512, 256):
        if n_main % cand == 0:
            lanes = cand
            break

    if n_main == n:
        # Common case (e.g. NCHW activations): pure bitcast reshape, no HBM copies.
        out2d = _swish_2d(x_flat.reshape(n // lanes, lanes), donate=donate)
        return out2d.reshape(orig_shape)

    # Unaligned case: kernel on the 128-aligned prefix (slice+reshape fused into
    # the Pallas operand via allow_input_fusion), tiny (<128 elem) tail in jnp.
    main2d = x_flat[:n_main].reshape(n_main // lanes, lanes)
    out_main = _swish_2d(main2d, allow_input_fusion=True).reshape(-1)
    out_tail = _jnp_swish(x_flat[n_main:])
    return jnp.concatenate([out_main, out_tail]).reshape(orig_shape)


if __name__ == "__main__":
    key = jax.random.PRNGKey(0)

    def _ref(v):
        vf = v.astype(jnp.float32)
        return (vf * jax.nn.sigmoid(vf)).astype(v.dtype)

    # 1) Small NCHW input consistent with how Swish is used after convs.
    x = jax.random.normal(key, (2, 4, 16, 16), dtype=jnp.float32)
    y = jax.block_until_ready(swish(x))
    assert y.shape == x.shape and y.dtype == x.dtype
    assert jnp.allclose(y, _ref(x), atol=1e-5, rtol=1e-5)

    # 2) Awkward size (not 128-aligned) -> exercises the aligned-prefix + jnp-tail path.
    k1, k2, k3 = jax.random.split(key, 3)
    x_odd = jax.random.normal(k1, (3, 5, 7, 11), dtype=jnp.float32)
    y_odd = jax.block_until_ready(swish(x_odd))
    assert y_odd.shape == x_odd.shape
    assert jnp.allclose(y_odd, _ref(x_odd), atol=1e-5, rtol=1e-5)

    # 3) Larger input -> exercises the forced multi-step grid (>=4 steps) with a
    #    partial final block and parallel dimension semantics.
    x_big = jax.random.normal(k2, (2, 16, 160, 160), dtype=jnp.float32)
    y_big = jax.block_until_ready(swish(x_big))
    assert jnp.allclose(y_big, _ref(x_big), atol=1e-5, rtol=1e-5)

    # 4) bf16 storage: byte-based block sizing, f32 in-kernel math (v5e-safe).
    x_bf = jax.random.normal(k3, (2, 4, 16, 16), dtype=jnp.bfloat16)
    y_bf = jax.block_until_ready(swish(x_bf))
    assert y_bf.dtype == jnp.bfloat16
    assert jnp.allclose(y_bf.astype(jnp.float32),
                        _ref(x_bf).astype(jnp.float32), atol=2e-2, rtol=2e-2)

    print("KERNEL_OK")
</pallas_src>

<mosaic_0001>
module attributes {stable_mosaic.version = 11 : i64} {
  func.func @_swish_kernel(%arg0: i32, %arg1: memref<2x1024xf32, #tpu.memory_space<vmem>>, %arg2: memref<2x1024xf32, #tpu.memory_space<vmem>>) attributes {dimension_semantics = [#tpu.dimension_semantics<parallel>], iteration_bounds = array<i64: 1>, scalar_prefetch = 0 : i64, scratch_operands = 0 : i64, tpu.core_type = #tpu.core_type<tc>, window_params = [{transform_indices = @transform_0, window_bounds = array<i64: 2, 1024>}, {transform_indices = @transform_1, window_bounds = array<i64: 2, 1024>}]} {
    %c0 = arith.constant 0 : index
    %c0_0 = arith.constant 0 : index
    %0 = vector.load %arg1[%c0, %c0_0] : memref<2x1024xf32, #tpu.memory_space<vmem>>, vector<2x1024xf32>
    %cst = arith.constant 0.000000e+00 : f32
    %1 = vector.broadcast %cst : f32 to vector<2x1024xf32>
    %2 = arith.subf %1, %0 : vector<2x1024xf32>
    %3 = math.exp %2 : vector<2x1024xf32>
    %cst_1 = arith.constant 1.000000e+00 : f32
    %4 = vector.broadcast %cst_1 : f32 to vector<2x1024xf32>
    %5 = arith.addf %4, %3 : vector<2x1024xf32>
    %6 = tpu.reciprocal %5 : vector<2x1024xf32> -> vector<2x1024xf32>
    %7 = arith.mulf %0, %6 : vector<2x1024xf32>
    %c0_2 = arith.constant 0 : index
    %c0_3 = arith.constant 0 : index
    %8 = vector.load %arg2[%c0_2, %c0_3] : memref<2x1024xf32, #tpu.memory_space<vmem>>, vector<2x1024xf32>
    tpu.vector_store %arg2[%c0_2, %c0_3], %7 {strides = array<i32>} : memref<2x1024xf32, #tpu.memory_space<vmem>>, vector<2x1024xf32>,
    return
  }
  func.func @transform_0(%arg0: i32) -> (i32, i32) {
    %c0_i32 = arith.constant 0 : i32
    %c0_i32_0 = arith.constant 0 : i32
    return %arg0, %c0_i32 : i32, i32
  }
  func.func @transform_1(%arg0: i32) -> (i32, i32) {
    %c0_i32 = arith.constant 0 : i32
    %c0_i32_0 = arith.constant 0 : i32
    return %arg0, %c0_i32 : i32, i32
  }
}

</mosaic_0001>

<bundles_post_ra>
// kernel: tpu_custom_call.1
= control target key start
LH: loop header
LB: loop body
LE: loop exit
PB: predicated region body
PF: predicated region fallthrough
CT: control target
= control target key end

     0   :  { %6 = vsyncpa [#allocation3], 0  ;;  %s146_s0 = inlined_call_operand.hbm [shape: f32[2,1024], index: 0, kind: input, shape index: {}]   ;;  %s147_s1 = inlined_call_operand.hbm [shape: f32[2,1024], index: 1, kind: output, shape index: {}]  }
   0x1   :  { %7 = vsyncpa [#allocation4], 0  ;;  %s110_s6 = smov [#allocation2]   ;;  %s62_s10 = scalar_lea.hbm %s146_s0, 256 }
   0x2   :  { %s14_s7 = sshll.u32 %s110_s6, 4  ;;  %p63_p0 = scmp.ne.s32.totalorder %s146_s0, %s62_s10  ;;  %s15_s7 = int_to_ptr.vmem [resolvable:$true] %s14_s7 }
   0x3   :  { %p66_p1 = scmp.lt.u32.totalorder %s62_s10, %s146_s0 }
   0x5   :  { %p68_p2 = pnand %p66_p1, %p63_p0 }
   0x7   :  { %71 = shalt.err (!%p68_p2)
}
   0x8   :  { %s72_s15 = scalar_lea.vmem %s15_s7, 256  ;;  %p77_p4 = scmp.lt.s32.totalorder %s15_s7, %s15_s7 }
   0x9   :  { %p73_p3 = scmp.ne.s32.totalorder %s15_s7, %s72_s15  ;;  %p78_p5 = scmp.lt.s32.totalorder %s72_s15, %s72_s15 }
   0xb   :  { %p79_p6 = por %p78_p5, %p77_p4 }
   0xd   :  { %p80_p7 = pnand %p79_p6, %p73_p3 }
   0xf   :  { %83 = shalt.err (!%p80_p7)
}
  0x10   :  { %17 = dma.hbm_to_vmem [thread:$0]  %s146_s0, 256, %s15_s7, [#allocation3]  }
  0x11   :  { %106 = dma.done.wait [#allocation3], 256  }
  0x12   :  { %107 = vsyncadd [#allocation3], 4294967040  ;;  %v21_v0 = vld [vmem:[#allocation2] sm:$0xff]  ;;  %v22_v1 = vld [vmem:[#allocation2 + $0x8] sm:$0xff]  ;;  %s111_s18 = smov [#allocation5]  }
  0x13   :  { %v23_v2 = vsub.f32 0.0, %v21_v0  ;;  %v24_v3 = vsub.f32 0.0, %v22_v1  ;;  %s43_s19 = sshll.u32 %s111_s18, 4  ;;  %s44_s19 = int_to_ptr.vmem [resolvable:$true] %s43_s19 }
  0x14   :  { %s84_s0 = scalar_lea.vmem %s44_s19, 256  ;;  %p89_p9 = scmp.lt.s32.totalorder %s44_s19, %s44_s19 }
  0x15   :  { %v25_v4 = vmul.f32 1.442695, %v23_v2  ;;  %v27_v5 = vmul.f32 1.442695, %v24_v3  ;;  %p85_p8 = scmp.ne.s32.totalorder %s44_s19, %s84_s0  ;;  %p90_p10 = scmp.lt.s32.totalorder %s84_s0, %s84_s0 }
  0x17   :  { %54 = vpow2.f32 %v25_v4  ;;  %p91_p11 = por %p90_p10, %p89_p9 }
  0x18   :  { %56 = vpow2.f32 %v27_v5 }
  0x19   :  { %p92_p12 = pnand %p91_p11, %p85_p8 }
  0x21   :  { %v55_v6 = vpop.eup %54 }
  0x22   :  { %v57_v7 = vpop.eup %56  ;;  %v29_v8 = vadd.f32 1.0, %v55_v6 }
  0x23   :  { %v30_v9 = vadd.f32 1.0, %v57_v7 }
  0x24   :  { %58 = vrcp.f32 %v29_v8 }
  0x25   :  { %60 = vrcp.f32 %v30_v9 }
  0x2e   :  { %v59_v10 = vpop.eup %58 }
  0x2f   :  { %v61_v11 = vpop.eup %60  ;;  %v33_v12 = vmul.f32 %v59_v10, %v21_v0 }
  0x30   :  { %v34_v13 = vmul.f32 %v61_v11, %v22_v1 }
  0x31   :  { %35 = vst [vmem:[#allocation5] sm:$0xff] %v33_v12 }
  0x32   :  { %36 = vst [vmem:[#allocation5 + $0x8] sm:$0xff] %v34_v13 }
  0x33   :  { %95 = shalt.err (!%p92_p12)
}
  0x34   :  { %s96_s22 = scalar_lea.hbm %s147_s1, 256 }
  0x35   :  { %p97_p13 = scmp.ne.s32.totalorder %s147_s1, %s96_s22  ;;  %p100_p0 = scmp.lt.u32.totalorder %s96_s22, %s147_s1 }
  0x37   :  { %p102_p1 = pnand %p100_p0, %p97_p13 }
  0x39   :  { %105 = shalt.err (!%p102_p1)
}
  0x3a   :  { %46 = dma.vmem_to_hbm [thread:$0]  %s44_s19, 256, %s147_s1, [#allocation4]  }
  0x3b   :  { %108 = dma.done.wait [#allocation4], 256  }
  0x3c   :  { %109 = vsyncadd [#allocation4], 4294967040 }
  0x3d   :  { %50 = vsyncpa [#allocation3], 1 }
  0x3e   :  { %51 = vsyncpa [#allocation4], 1 }

</bundles_post_ra>
